<compile_context>
chip_gen: v6e
topology: v6e:2x2x1
jax: 0.10.0
libtpu: 0.0.40
codegen_flags: <defaults>
</compile_context>

<pallas_src>
import functools
import numpy as np
import jax
import jax.numpy as jnp
from jax import lax
from jax.experimental import pallas as pl
from jax.experimental.pallas import tpu as pltpu


def _fpe_kernel(x_ref, sig_ref, off_ref, out_ref, *, ll, pack):
    # x_ref:   (TILE_R, pack)   native dtype, `pack` scalar features per output row
    # sig_ref: (1, W)           f32, lane-expanded sigma (0 on pad lanes)
    # off_ref: (1, W)           f32, 0 on sin half, pi/2 on cos half (0 on pad lanes)
    # out_ref: (TILE_R, W)      lane-dense packed output
    two_l = 2 * ll
    w = out_ref.shape[-1]

    x = x_ref[...].astype(jnp.float32)          # upcast in vregs
    sig = sig_ref[...]
    off = off_ref[...]

    if pack == 1:
        xb = x[:, 0:1]                          # plain lane broadcast
    elif pack == 2:
        lane = lax.broadcasted_iota(jnp.int32, (1, w), 1)
        xb = jnp.where(lane >= two_l, x[:, 1:2], x[:, 0:1])   # single VPU select
    else:
        # pack > 2: broadcast-by-matmul on the otherwise-idle MXU; 0/1 one-hot at
        # HIGHEST precision reproduces x exactly on the selected lanes.
        lane = lax.broadcasted_iota(jnp.int32, (pack, w), 1)
        row = lax.broadcasted_iota(jnp.int32, (pack, w), 0)
        onehot = ((lane // two_l) == row).astype(jnp.float32)
        xb = jnp.dot(x, onehot, preferred_element_type=jnp.float32,
                     precision=lax.Precision.HIGHEST)

    # cos(phase) == sin(phase + pi/2): one EUP op per lane, no select.
    out_ref[...] = jnp.sin(xb * sig + off).astype(out_ref.dtype)


def fixed_positional_encoding(x, proj_dims, val=0.1, *, tile_rows=8192,
                              out_dtype=jnp.float32):
    """x: (..., 1); returns (..., proj_dims) with [sin(x*sigma), cos(x*sigma)].

    out_dtype=jnp.bfloat16 halves HBM store bytes (compute stays f32); default f32
    preserves the torch module's output dtype exactly.
    """
    assert x.shape[-1] == 1, "ATISS FixedPositionalEncoding is applied to scalar features (..., 1)"
    assert proj_dims % 2 == 0
    ll = proj_dims // 2
    two_l = 2 * ll
    lead = x.shape[:-1]
    n = int(np.prod(lead)) if lead else 1

    # Pack factor: how many logical (2*ll)-wide rows fit in one 128-lane output row.
    pack = (128 // two_l) if (two_l <= 128 and 128 % two_l == 0) else 1
    w_logical = pack * two_l
    w = pl.cdiv(w_logical, 128) * 128           # lane-dense (multiple-of-128) output width

    # sigma exactly as in the torch module: 2*pi / val**(2*arange(ll)/proj_dims)
    exb = 2.0 * jnp.arange(ll, dtype=jnp.float32) / float(proj_dims)
    sigma = (2.0 * jnp.pi) / jnp.power(jnp.float32(val), exb)            # (ll,)
    sig_block = jnp.concatenate([sigma, sigma], axis=0)                  # (2*ll,)
    off_block = jnp.concatenate([jnp.zeros((ll,), jnp.float32),
                                 jnp.full((ll,), jnp.pi / 2, dtype=jnp.float32)], axis=0)
    sig_lane = jnp.tile(sig_block, pack)
    off_lane = jnp.tile(off_block, pack)
    if w > w_logical:                            # pad lanes: sigma=off=0 -> sin(0)=0, sliced off
        sig_lane = jnp.pad(sig_lane, (0, w - w_logical))
        off_lane = jnp.pad(off_lane, (0, w - w_logical))
    sig_lane = sig_lane.reshape(1, w)
    off_lane = off_lane.reshape(1, w)

    # Rows after packing; aim for >=4 grid steps (megacore) and a tile multiple of 16.
    r = pl.cdiv(n, pack)
    tile_r = min(tile_rows, pl.cdiv(r, 4))
    tile_r = max(16, pl.cdiv(tile_r, 16) * 16)
    r_pad = pl.cdiv(r, tile_r) * tile_r

    x_flat = x.reshape(-1)                       # native dtype; upcast happens in-kernel
    pad = r_pad * pack - n
    if pad:
        x_flat = jnp.pad(x_flat, (0, pad))
    x_packed = x_flat.reshape(r_pad, pack)

    grid = (r_pad // tile_r,)
    kernel = functools.partial(_fpe_kernel, ll=ll, pack=pack)
    out_itemsize = jnp.dtype(out_dtype).itemsize

    out = pl.pallas_call(
        kernel,
        out_shape=jax.ShapeDtypeStruct((r_pad, w), out_dtype),
        grid=grid,
        in_specs=[
            pl.BlockSpec((tile_r, pack), lambda i: (i, 0)),   # x rows, tiled over grid
            pl.BlockSpec((1, w), lambda i: (0, 0)),           # sigma lanes, fetched once
            pl.BlockSpec((1, w), lambda i: (0, 0)),           # phase offsets, fetched once
        ],
        out_specs=pl.BlockSpec((tile_r, w), lambda i: (i, 0)),
        compiler_params=pltpu.CompilerParams(
            dimension_semantics=("parallel",),                # shard rows across TCs (v7x)
            vmem_limit_bytes=32 << 20,                        # large tiles also fit on v5e
        ),
        cost_estimate=pl.CostEstimate(
            flops=2 * n * two_l,                              # mul + add per output lane
            transcendentals=n * two_l,                        # single sin per lane now
            bytes_accessed=x.dtype.itemsize * n + out_itemsize * n * two_l,
        ),
    )(x_packed, sig_lane, off_lane)

    if w == w_logical:
        # (r_pad, pack*2*ll) row-major == (r_pad*pack, 2*ll) row-major; trim padded tail.
        out = out.reshape(-1)[: n * two_l].reshape(*lead, two_l)
    else:
        # pack==1 lane-padded fallback: slice the padded lanes off.
        out = out[:n, :two_l].reshape(*lead, two_l)
    return out


if __name__ == "__main__":
    proj_dims = 64            # -> ll = 32, output last dim = 64, pack = 2, W = 128
    batch, seq = 2, 8

    key = jax.random.PRNGKey(0)
    x = jax.random.uniform(key, (batch, seq, 1), dtype=jnp.float32)

    out = fixed_positional_encoding(x, proj_dims, val=0.1)
    out = jax.block_until_ready(out)

    # Pure-JAX reference (same semantics as the torch forward).
    ll = proj_dims // 2
    exb = 2.0 * jnp.arange(ll, dtype=jnp.float32) / float(proj_dims)
    sigma_ref = ((2.0 * jnp.pi) / jnp.power(jnp.float32(0.1), exb)).reshape(1, ll)
    phase = x * sigma_ref
    ref = jnp.concatenate([jnp.sin(phase), jnp.cos(phase)], axis=-1)

    # sin(phase + pi/2) vs cos(phase) differ only at ULP level; tolerance covers it.
    np.testing.assert_allclose(np.asarray(out), np.asarray(ref), rtol=1e-5, atol=1e-4)
    assert out.shape == (batch, seq, proj_dims)

    print("KERNEL_OK")
</pallas_src>

<mosaic_0001>
module attributes {stable_mosaic.version = 11 : i64} {
  func.func @_fpe_kernel(%arg0: i32, %arg1: memref<16x2xf32, #tpu.memory_space<vmem>>, %arg2: memref<1x128xf32, #tpu.memory_space<vmem>>, %arg3: memref<1x128xf32, #tpu.memory_space<vmem>>, %arg4: memref<16x128xf32, #tpu.memory_space<vmem>>) attributes {dimension_semantics = [#tpu.dimension_semantics<parallel>], iteration_bounds = array<i64: 1>, scalar_prefetch = 0 : i64, scratch_operands = 0 : i64, tpu.core_type = #tpu.core_type<tc>, window_params = [{transform_indices = @transform_0, window_bounds = array<i64: 16, 2>}, {pipeline_mode = #tpu.pipeline_mode<synchronous>, transform_indices = @transform_1, window_bounds = array<i64: 1, 128>}, {pipeline_mode = #tpu.pipeline_mode<synchronous>, transform_indices = @transform_2, window_bounds = array<i64: 1, 128>}, {transform_indices = @transform_3, window_bounds = array<i64: 16, 128>}]} {
    %c0 = arith.constant 0 : index
    %c0_0 = arith.constant 0 : index
    %0 = vector.load %arg1[%c0, %c0_0] : memref<16x2xf32, #tpu.memory_space<vmem>>, vector<16x2xf32>
    %c0_1 = arith.constant 0 : index
    %c0_2 = arith.constant 0 : index
    %1 = vector.load %arg2[%c0_1, %c0_2] : memref<1x128xf32, #tpu.memory_space<vmem>>, vector<1x128xf32>
    %c0_3 = arith.constant 0 : index
    %c0_4 = arith.constant 0 : index
    %2 = vector.load %arg3[%c0_3, %c0_4] : memref<1x128xf32, #tpu.memory_space<vmem>>, vector<1x128xf32>
    %3 = tpu.iota {dimensions = array<i32: 1>} : vector<1x128xi32>
    %c64_i32 = arith.constant 64 : i32
    %4 = vector.broadcast %c64_i32 : i32 to vector<1x128xi32>
    %5 = arith.cmpi sge, %3, %4 : vector<1x128xi32>
    %6 = vector.extract_strided_slice %0 {offsets = [0, 1], sizes = [16, 1], strides = [1, 1]} : vector<16x2xf32> to vector<16x1xf32>
    %7 = vector.extract_strided_slice %0 {offsets = [0, 0], sizes = [16, 1], strides = [1, 1]} : vector<16x2xf32> to vector<16x1xf32>
    %8 = vector.shape_cast %5 : vector<1x128xi1> to vector<1x128xi1>
    %9 = vector.broadcast %8 : vector<1x128xi1> to vector<16x128xi1>
    %10 = vector.shape_cast %6 : vector<16x1xf32> to vector<16x1xf32>
    %11 = vector.broadcast %10 : vector<16x1xf32> to vector<16x128xf32>
    %12 = vector.shape_cast %7 : vector<16x1xf32> to vector<16x1xf32>
    %13 = vector.broadcast %12 : vector<16x1xf32> to vector<16x128xf32>
    %14 = arith.select %9, %11, %13 : vector<16x128xi1>, vector<16x128xf32>
    %15 = vector.broadcast %1 : vector<1x128xf32> to vector<16x128xf32>
    %16 = arith.mulf %14, %15 : vector<16x128xf32>
    %17 = vector.broadcast %2 : vector<1x128xf32> to vector<16x128xf32>
    %18 = arith.addf %16, %17 : vector<16x128xf32>
    %19 = math.sin %18 : vector<16x128xf32>
    %c0_5 = arith.constant 0 : index
    %c0_6 = arith.constant 0 : index
    %20 = vector.load %arg4[%c0_5, %c0_6] : memref<16x128xf32, #tpu.memory_space<vmem>>, vector<16x128xf32>
    tpu.vector_store %arg4[%c0_5, %c0_6], %19 {strides = array<i32>} : memref<16x128xf32, #tpu.memory_space<vmem>>, vector<16x128xf32>,
    return
  }
  func.func @transform_0(%arg0: i32) -> (i32, i32) {
    %c0_i32 = arith.constant 0 : i32
    %c0_i32_0 = arith.constant 0 : i32
    return %arg0, %c0_i32 : i32, i32
  }
  func.func @transform_1(%arg0: i32) -> (i32, i32) {
    %c0_i32 = arith.constant 0 : i32
    %c0_i32_0 = arith.constant 0 : i32
    %c0_i32_1 = arith.constant 0 : i32
    return %c0_i32, %c0_i32_0 : i32, i32
  }
  func.func @transform_2(%arg0: i32) -> (i32, i32) {
    %c0_i32 = arith.constant 0 : i32
    %c0_i32_0 = arith.constant 0 : i32
    %c0_i32_1 = arith.constant 0 : i32
    return %c0_i32, %c0_i32_0 : i32, i32
  }
  func.func @transform_3(%arg0: i32) -> (i32, i32) {
    %c0_i32 = arith.constant 0 : i32
    %c0_i32_0 = arith.constant 0 : i32
    return %arg0, %c0_i32 : i32, i32
  }
}

</mosaic_0001>

<bundles_post_ra>
// kernel: tpu_custom_call.1
= control target key start
LH: loop header
LB: loop body
LE: loop exit
PB: predicated region body
PF: predicated region fallthrough
CT: control target
= control target key end

     0   :  { %v348_v1 = vmov 0   ;;  %v349_v2 = vmov 1   ;;  %s462_s0 = inlined_call_operand.vmem [shape: f32[16,2], index: 0, kind: input, shape index: {}]   ;;  %s463_s1 = inlined_call_operand.vmem [shape: f32[1,128], index: 1, kind: input, shape index: {}]   ;;  %s464_s2 = inlined_call_operand.vmem [shape: f32[1,128], index: 2, kind: input, shape index: {}]   ;;  %s465_s3 = inlined_call_operand.hbm [shape: f32[16,128], index: 3, kind: output, shape index: {}]  }
   0x1   :  { %v15_v0 = vld [vmem:[%s462_s0] sm:$0xff]  ;;  %316 = vset.pattern.permute.xlu1 %v348_v1  ;;  %315 = vset.pattern.permute.xlu0 %v349_v2  ;;  %v16_v3 = vld [vmem:[%s462_s0 + $0x8] sm:$0xff] }
   0x2   :  { %35 = vperm.xlu1 %316, %v15_v0   ;;  %26 = vperm.xlu0 %315, %v15_v0  }
   0x3   :  { %8 = vsyncpa [#allocation3], 0  ;;  %v19_v4 = vlaneseq  ;;  %v286_v6 = vld [vmem:[%s463_s1] ss:$0 sm:$0xff]  ;;  %v350_v34 = vmov 683565275  }
   0x4   :  { %v287_v9 = vld [vmem:[%s464_s2] ss:$0 sm:$0xff]  ;;  %v351_v38 = vmov 2475754826   ;;  %v352_v40 = vmov 2131351028  }
   0x5   :  { %v20_v5 = vand.u32 127, %v19_v4  ;;  %v353_v42 = vmov 2102212464   ;;  %v354_v44 = vmov 920167782   ;;  %s356_s0 = smov [#allocation2]  }
   0x6   :  { %39 = vperm.xlu1 %316, %v16_v3   ;;  %31 = vperm.xlu0 %315, %v16_v3   ;;  %v355_v51 = vmov 1326507024   ;;  %s275_s1 = sshll.u32 %s356_s0, 4  ;;  %s276_s1 = int_to_ptr.vmem [resolvable:$true] %s275_s1 }
   0x7   :  { %vm21_vm0 = vcmp.ge.s32.totalorder %v20_v5, 64  ;;  %s326_s2 = scalar_lea.vmem %s276_s1, 256  ;;  %p331_p1 = scmp.lt.s32.totalorder %s276_s1, %s276_s1 }
   0x8   :  { %p327_p0 = scmp.ne.s32.totalorder %s276_s1, %s326_s2  ;;  %p332_p2 = scmp.lt.s32.totalorder %s326_s2, %s326_s2 }
   0xa   :  { %317 = vset.pattern.permute.xlu0 %v348_v1  ;;  %p333_p3 = por %p332_p2, %p331_p1 }
   0xc   :  { %p334_p4 = pnand %p333_p3, %p327_p0 }
  0x7d   :  { %v36_v7 = vpop.permute.xlu1 %35  ;;  %v27_v8 = vpop.permute.xlu0 %26 }
  0x7e   :  { %v42_v10 = vsel %vm21_vm0, %v27_v8, %v36_v7 }
  0x7f   :  { %v50_v11 = vmul.f32 %v286_v6, %v42_v10 }
  0x81   :  { %v391_v12 = vadd.f32 %v287_v9, %v50_v11  ;;  %v40_v13 = vpop.permute.xlu1 %39  ;;  %v32_v14 = vpop.permute.xlu0 %31 }
  0x82   :  { %v43_v15 = vsel %vm21_vm0, %v32_v14, %v40_v13 }
  0x83   :  { %v60_v16 = vand.u32 2147483647, %v391_v12  ;;  %v63_v17 = vand.u32 2139095040, %v391_v12  ;;  %v51_v18 = vmul.f32 %v286_v6, %v43_v15  ;;  %vm62_vm15 = vcmp.lt.s32.totalorder %v391_v12, 0 }
  0x85   :  { %v64_v19 = vshrl.u32 %v63_v17, 23  ;;  %v395_v20 = vadd.f32 %v287_v9, %v51_v18  ;;  %v67_v21 = vand.u32 8388607, %v60_v16  ;;  %vm61_vm0 = vcmp.le.f32.partialorder %v60_v16, 0.7853982 }
  0x87   :  { %v288_v22 = vadd.s32 4294967169, %v64_v19  ;;  %v167_v23 = vand.u32 2139095040, %v395_v20  ;;  %v68_v25 = vor.u32 8388608, %v67_v21  ;;  %v164_v27 = vand.u32 2147483647, %v395_v20 }
  0x89   :  { %v70_v24 = vadd.s32 1, %v288_v22  ;;  %v168_v26 = vshrl.u32 %v167_v23, 23  ;;  %v401_v32 = vshll.u32 %v68_v25, 8  ;;  %v171_v36 = vand.u32 8388607, %v164_v27 }
  0x8b   :  { %vm71_vm1 = vcmp.gt.s32.totalorder %v70_v24, 0  ;;  %v292_v29 = vadd.s32 4294967169, %v168_v26  ;;  %v172_v2 = vor.u32 8388608, %v171_v36 }
  0x8c   :  { %v72_v28 = vsel %vm71_vm1, %v70_v24, 0  ;;  %vm166_vm1 = vcmp.lt.s32.totalorder %v395_v20, 0 }
  0x8d   :  { %v73_v30 = vshrl.u32 %v72_v28, 5  ;;  %v74_v31 = vand.u32 31, %v72_v28  ;;  %v174_v37 = vadd.s32 1, %v292_v29  ;;  %v212_v17 = vshll.u32 %v172_v2, 8 }
  0x8f   :  { %v75_v33 = vsub.s32 32, %v74_v31  ;;  %v77_v35 = vshll.u32 %v350_v34, %v74_v31  ;;  %v80_v39 = vshll.u32 %v351_v38, %v74_v31  ;;  %v83_v41 = vshll.u32 %v352_v40, %v74_v31 }
  0x90   :  { %v86_v43 = vshll.u32 %v353_v42, %v74_v31  ;;  %v89_v45 = vshll.u32 %v354_v44, %v74_v31  ;;  %vm92_vm2 = vcmp.lt.s32.totalorder %v73_v30, 1  ;;  %vm94_vm3 = vcmp.lt.s32.totalorder %v73_v30, 3 }
  0x91   :  { %v78_v46 = vshrl.u32 %v351_v38, %v75_v33  ;;  %v81_v47 = vshrl.u32 %v352_v40, %v75_v33  ;;  %v84_v48 = vshrl.u32 %v353_v42, %v75_v33  ;;  %v76_v49 = vshrl.u32 %v350_v34, %v75_v33 }
  0x92   :  { %v87_v50 = vshrl.u32 %v354_v44, %v75_v33  ;;  %v90_v52 = vshrl.u32 %v355_v51, %v75_v33  ;;  %vm175_vm4 = vcmp.gt.s32.totalorder %v174_v37, 0  ;;  %vm95_vm5 = vcmp.lt.s32.totalorder %v73_v30, 4 }
  0x93   :  { %v79_v53 = vor.u32 %v78_v46, %v77_v35  ;;  %v82_v54 = vor.u32 %v81_v47, %v80_v39  ;;  %v85_v55 = vor.u32 %v84_v48, %v83_v41  ;;  %v176_v58 = vsel %vm175_vm4, %v174_v37, 0 }
  0x94   :  { %v88_v56 = vor.u32 %v87_v50, %v86_v43  ;;  %v91_v57 = vor.u32 %v90_v52, %v89_v45  ;;  %vm93_vm6 = vcmp.lt.s32.totalorder %v73_v30, 2  ;;  %v178_v5 = vand.u32 31, %v176_v58 }
  0x95   :  { %v96_v59 = vsel %vm92_vm2, %v76_v49, %v79_v53  ;;  %v97_v60 = vsel %vm95_vm5, %v85_v55, 2102212464  ;;  %v100_v61 = vsel %vm92_vm2, %v79_v53, %v82_v54  ;;  %v104_v62 = vsel %vm92_vm2, %v82_v54, %v85_v55 }
  0x96   :  { %v98_v63 = vsel %vm94_vm3, %v82_v54, %v97_v60  ;;  %v101_v0 = vsel %vm95_vm5, %v88_v56, 920167782  ;;  %v105_v1 = vsel %vm95_vm5, %v91_v57, 1326507024  ;;  %v177_v14 = vshrl.u32 %v176_v58, 5 }
  0x97   :  { %v102_v3 = vsel %vm94_vm3, %v85_v55, %v101_v0  ;;  %v106_v4 = vsel %vm94_vm3, %v88_v56, %v105_v1  ;;  %v99_v6 = vsel %vm93_vm6, %v96_v59, %v98_v63  ;;  %v179_v15 = vsub.s32 32, %v178_v5 }
  0x98   :  { %v103_v7 = vsel %vm93_vm6, %v100_v61, %v102_v3  ;;  %v107_v8 = vsel %vm93_vm6, %v104_v62, %v106_v4  ;;  %v115_v18 = vmul.u32 %v401_v32, %v99_v6  ;;  %v181_v19 = vshll.u32 %v350_v34, %v178_v5 }
  0x99   :  { %v414_v9 = vmul.u32.u64.low %v401_v32, %v107_v8  ;;  %v415_v10 = vmul.u32.u64.high %v401_v32, %v107_v8, %v414_v9  ;;  %v418_v11 = vmul.u32.u64.low %v401_v32, %v103_v7  ;;  %v419_v13 = vmul.u32.u64.high %v401_v32, %v103_v7, %v418_v11 }
  0x9a   :  { %v184_v21 = vshll.u32 %v351_v38, %v178_v5  ;;  %v187_v22 = vshll.u32 %v352_v40, %v178_v5  ;;  %v182_v23 = vshrl.u32 %v351_v38, %v179_v15  ;;  %v185_v24 = vshrl.u32 %v352_v40, %v179_v15 }
  0x9b   :  { %v188_v25 = vshrl.u32 %v353_v42, %v179_v15  ;;  %v190_v26 = vshll.u32 %v353_v42, %v178_v5  ;;  %vm117_vm7 = vc.u32 %v415_v10, %v418_v11  ;;  %v118_v28 = vadd.s32 1, %v419_v13 }
  0x9c   :  { %v191_v29 = vshrl.u32 %v354_v44, %v179_v15  ;;  %v193_v30 = vshll.u32 %v354_v44, %v178_v5  ;;  %v183_v31 = vor.u32 %v182_v23, %v181_v19  ;;  %v186_v33 = vor.u32 %v185_v24, %v184_v21 }
  0x9d   :  { %v189_v35 = vor.u32 %v188_v25, %v187_v22  ;;  %v194_v36 = vshrl.u32 %v355_v51, %v179_v15  ;;  %v119_v32 = vsel %vm117_vm7, %v118_v28, %v419_v13  ;;  %vm196_vm8 = vcmp.lt.s32.totalorder %v177_v14, 1 }
  0x9e   :  { %v192_v37 = vor.u32 %v191_v29, %v190_v26  ;;  %vm199_vm9 = vcmp.lt.s32.totalorder %v177_v14, 4  ;;  %v120_v38 = vadd.s32 %v119_v32, %v115_v18  ;;  %vm198_vm10 = vcmp.lt.s32.totalorder %v177_v14, 3 }
  0x9f   :  { %v195_v39 = vor.u32 %v194_v36, %v193_v30  ;;  %v201_v40 = vsel %vm199_vm9, %v189_v35, 2102212464  ;;  %v180_v41 = vshrl.u32 %v350_v34, %v179_v15  ;;  %v204_v42 = vsel %vm196_vm8, %v183_v31, %v186_v33 }
  0xa0   :  { %v205_v43 = vsel %vm199_vm9, %v192_v37, 920167782  ;;  %v208_v45 = vsel %vm196_vm8, %v186_v33, %v189_v35  ;;  %v121_v46 = vadd.s32 536870912, %v120_v38  ;;  %vm197_vm11 = vcmp.lt.s32.totalorder %v177_v14, 2 }
  0xa1   :  { %v206_v44 = vsel %vm198_vm10, %v189_v35, %v205_v43  ;;  %v209_v47 = vsel %vm199_vm9, %v195_v39, 1326507024  ;;  %v200_v48 = vsel %vm196_vm8, %v180_v41, %v183_v31  ;;  %v202_v49 = vsel %vm198_vm10, %v186_v33, %v201_v40 }
  0xa2   :  { %v207_v50 = vsel %vm197_vm11, %v204_v42, %v206_v44  ;;  %v210_v51 = vsel %vm198_vm10, %v192_v37, %v209_v47  ;;  %v122_v52 = vshrl.u32 %v121_v46, 30  ;;  %v203_v58 = vsel %vm197_vm11, %v200_v48, %v202_v49 }
  0xa3   :  { %v211_v53 = vsel %vm197_vm11, %v208_v45, %v210_v51  ;;  %v429_v54 = vmul.u32.u64.low %v212_v17, %v207_v50  ;;  %v430_v55 = vmul.u32.u64.high %v212_v17, %v207_v50, %v429_v54  ;;  %v219_v61 = vmul.u32 %v212_v17, %v203_v58 }
  0xa4   :  { %v432_v56 = vmul.u32.u64.low %v212_v17, %v211_v53  ;;  %v433_v57 = vmul.u32.u64.high %v212_v17, %v211_v53, %v432_v56  ;;  %v123_v34 = vshll.u32 %v122_v52, 30  ;;  %v116_v9 = vadd.s32 %v418_v11, %v415_v10 }
  0xa5   :  { %v222_v60 = vadd.s32 1, %v430_v55  ;;  %vm448_vm2 = vcmp.le.f32.partialorder %v164_v27, 0.7853982  ;;  %vm152_vm6 = vweird.f32 %v391_v12  ;;  %vm256_vm10 = vweird.f32 %v395_v20 }
  0xa6   :  { %v124_v59 = vsub.s32 %v120_v38, %v123_v34  ;;  %vm221_vm12 = vc.u32 %v433_v57, %v429_v54  ;;  %v220_v33 = vadd.s32 %v429_v54, %v433_v57  ;;  %v146_v38 = vsub.s32 4, %v122_v52 }
  0xa7   :  { %v223_v63 = vsel %vm221_vm12, %v222_v60, %v430_v55 }
  0xa8   :  { %v126_v62 = vsub.s32 0, %v124_v59  ;;  %v224_v0 = vadd.s32 %v223_v63, %v219_v61  ;;  %v147_v45 = vsel %vm62_vm15, %v146_v38, %v122_v52 }
  0xa9   :  { %v149_v47 = vsel %vm61_vm0, 0, %v147_v45 }
  0xaa   :  { %v289_v1 = vmin.u32 %v126_v62, %v124_v59  ;;  %v225_v2 = vadd.s32 536870912, %v224_v0  ;;  %v153_v50 = vadd.s32 3, %v149_v47 }
  0xac   :  { %v128_v3 = vclz %v289_v1  ;;  %v226_v4 = vshrl.u32 %v225_v2, 30  ;;  %v154_v54 = vand.u32 3, %v153_v50 }
  0xae   :  { %v290_v5 = vadd.s32 4294967294, %v128_v3  ;;  %v227_v6 = vshll.u32 %v226_v4, 30  ;;  %v250_v51 = vsub.s32 4, %v226_v4  ;;  %vm159_vm3 = vcmp.eq.s32.totalorder %v154_v54, 2 }
  0xaf   :  { %vm156_vm4 = vcmp.eq.s32.totalorder %v154_v54, 0  ;;  %vm155_vm5 = vcmp.lt.s32.totalorder %v154_v54, 2 }
  0xb0   :  { %vm291_vm13 = vcmp.lt.s32.totalorder %v290_v5, 0  ;;  %v228_v8 = vsub.s32 %v224_v0, %v227_v6  ;;  %v251_v55 = vsel %vm166_vm1, %v250_v51, %v226_v4 }
  0xb1   :  { %v131_v7 = vsel %vm291_vm13, 0, %v290_v5  ;;  %v253_v27 = vsel %vm448_vm2, 0, %v251_v55 }
  0xb2   :  { %v132_v13 = vsub.s32 32, %v131_v7  ;;  %v136_v14 = vsub.s32 4294967266, %v131_v7  ;;  %v230_v15 = vsub.s32 0, %v228_v8  ;;  %v133_v17 = vshll.u32 %v124_v59, %v131_v7 }
  0xb3   :  { %v257_v62 = vadd.s32 3, %v253_v27 }
  0xb4   :  { %v134_v18 = vshrl.u32 %v116_v9, %v132_v13  ;;  %v137_v19 = vadd.s32 127, %v136_v14  ;;  %v293_v21 = vmin.u32 %v230_v15, %v228_v8 }
  0xb5   :  { %v258_v0 = vand.u32 3, %v257_v62 }
  0xb6   :  { %v135_v22 = vor.u32 %v134_v18, %v133_v17  ;;  %v138_v23 = vshll.u32 %v137_v19, 23  ;;  %v232_v24 = vclz %v293_v21 }
  0xb7   :  { %vm263_vm7 = vcmp.eq.s32.totalorder %v258_v0, 2  ;;  %vm260_vm8 = vcmp.eq.s32.totalorder %v258_v0, 0  ;;  %vm259_vm9 = vcmp.lt.s32.totalorder %v258_v0, 2 }
  0xb8   :  { %v139_v25 = vor.u32 4788187, %v138_v23  ;;  %v294_v26 = vadd.s32 4294967294, %v232_v24  ;;  %v142_v29 = vcvt.s32.f32 %v135_v22 }
  0xba   :  { %v140_v28 = vand.u32 2147483647, %v139_v25  ;;  %vm295_vm14 = vcmp.lt.s32.totalorder %v294_v26, 0 }
  0xbb   :  { %v235_v31 = vsel %vm295_vm14, 0, %v294_v26 }
  0xbc   :  { %v143_v30 = vmul.f32 %v142_v29, %v140_v28  ;;  %v236_v10 = vsub.s32 32, %v235_v31  ;;  %v240_v11 = vsub.s32 4294967266, %v235_v31  ;;  %v237_v36 = vshll.u32 %v228_v8, %v235_v31 }
  0xbe   :  { %v144_v35 = vxor.u32 2147483648, %v143_v30  ;;  %v238_v32 = vshrl.u32 %v220_v33, %v236_v10  ;;  %v241_v37 = vadd.s32 127, %v240_v11 }
  0xc0   :  { %v145_v39 = vsel %vm62_vm15, %v144_v35, %v143_v30  ;;  %v239_v41 = vor.u32 %v238_v32, %v237_v36  ;;  %v242_v42 = vshll.u32 %v241_v37, 23 }
  0xc1   :  { %v148_v40 = vsel %vm61_vm0, %v391_v12, %v145_v39 }
  0xc2   :  { %318 = vcosq.f32 %v148_v40  ;;  %v243_v43 = vor.u32 4788187, %v242_v42  ;;  %v246_v44 = vcvt.s32.f32 %v239_v41 }
  0xc3   :  { %320 = vsinq.f32 %v148_v40 }
  0xc4   :  { %v244_v46 = vand.u32 2147483647, %v243_v43 }
  0xc6   :  { %v247_v48 = vmul.f32 %v246_v44, %v244_v46 }
  0xc8   :  { %v248_v49 = vxor.u32 2147483648, %v247_v48 }
  0xca   :  { %v249_v53 = vsel %vm166_vm1, %v248_v49, %v247_v48 }
  0xcb   :  { %v252_v52 = vsel %vm448_vm2, %v395_v20, %v249_v53 }
  0xcc   :  { %322 = vcosq.f32 %v252_v52 }
  0xcd   :  { %324 = vsinq.f32 %v252_v52 }
  0xcf   :  { %v319_v56 = vpop.eup %318 }
  0xd0   :  { %v321_v57 = vpop.eup %320  ;;  %v160_v34 = vxor.u32 2147483648, %v319_v56 }
  0xd1   :  { %v157_v58 = vxor.u32 2147483648, %v321_v57 }
  0xd2   :  { %v161_v59 = vsel %vm159_vm3, %v160_v34, %v321_v57 }
  0xd3   :  { %v158_v60 = vsel %vm156_vm4, %v319_v56, %v157_v58 }
  0xd4   :  { %v162_v61 = vsel %vm155_vm5, %v158_v60, %v161_v59 }
  0xd5   :  { %v163_v63 = vsel %vm152_vm6, nan, %v162_v61 }
  0xd6   :  { %268 = vst [vmem:[#allocation2] sm:$0xff] %v163_v63 }
  0xd9   :  { %v323_v1 = vpop.eup %322 }
  0xda   :  { %v325_v2 = vpop.eup %324  ;;  %v264_v3 = vxor.u32 2147483648, %v323_v1 }
  0xdb   :  { %v261_v4 = vxor.u32 2147483648, %v325_v2 }
  0xdc   :  { %v265_v5 = vsel %vm263_vm7, %v264_v3, %v325_v2 }
  0xdd   :  { %v262_v6 = vsel %vm260_vm8, %v323_v1, %v261_v4 }
  0xde   :  { %v266_v7 = vsel %vm259_vm9, %v262_v6, %v265_v5 }
  0xdf   :  { %v267_v12 = vsel %vm256_vm10, nan, %v266_v7 }
  0xe0   :  { %269 = vst [vmem:[#allocation2 + $0x8] sm:$0xff] %v267_v12 }
  0xe1   :  { %337 = shalt.err (!%p334_p4)
}
  0xe2   :  { %s357_s20 = smov 128   ;;  %s358_s21 = smov 8  }
  0xe3   :  { %281 = dma.vmem_to_hbm [thread:$0]  %s276_s1, 256, %s465_s3, [#allocation3], %s357_s20, %s357_s20, %s358_s21  }
  0xe4   :  { %346 = dma.done.wait [#allocation3], 256  }
  0xe5   :  { %347 = vsyncadd [#allocation3], 4294967040 }
  0xe6   :  { %285 = vsyncpa [#allocation3], 1 }

</bundles_post_ra>
